<compile_context>
chip_gen: v5e
topology: v5e:2x2
jax: 0.10.0
libtpu: 0.0.40
codegen_flags: <defaults>
</compile_context>

<pallas_src>
import jax
import jax.numpy as jnp
from jax.experimental import pallas as pl
from jax.experimental.pallas import tpu as pltpu


# ----------------------------------------------------------------------------
# Init-time constant: the sinusoidal positional-encoding table (== register_buffer)
# ----------------------------------------------------------------------------
def make_pe_table(dim, max_len=4096, dtype=jnp.float32):
    """pe[:, 0::2] = sin(pos / denom), pe[:, 1::2] = cos(pos / denom).

    Build once at init and (like the perf review suggests) build it directly in the
    activation dtype so the kernel never pays f32<->bf16 converts or extra DMA bytes.
    """
    # The PyTorch original also requires an even feature dim (odd dim would broadcast-fail).
    assert dim % 2 == 0, "PositionalEncoding requires an even feature dim"
    pos = jnp.arange(max_len, dtype=jnp.float32)[:, None]          # (max_len, 1)
    i = jnp.arange(dim // 2, dtype=jnp.float32)                    # (dim//2,)
    denom = jnp.power(10000.0, 2.0 * i / dim)                      # (dim//2,)
    ang = pos / denom                                              # (max_len, dim//2)
    # interleave sin/cos along the feature axis -> columns 0,2,4,.. = sin ; 1,3,5,.. = cos
    pe = jnp.stack([jnp.sin(ang), jnp.cos(ang)], axis=-1).reshape(max_len, dim)
    return pe.astype(dtype)


# ----------------------------------------------------------------------------
# Pallas kernel: one (bb, tl, td) tile of x plus the matching (tl, td) tile of pe
# ----------------------------------------------------------------------------
def add_pe_kernel(x_ref, pe_ref, o_ref):
    # x_ref: (bb, tl, td), pe_ref: (tl, td) -> broadcast add over the batch block (VPU).
    # pe is pre-cast to x.dtype, so no per-element converts happen here.
    o_ref[...] = (x_ref[...] + pe_ref[...]).astype(o_ref.dtype)


# ----------------------------------------------------------------------------
# Tiling helpers
# ----------------------------------------------------------------------------
_VMEM_BUDGET = 12 * 1024 * 1024   # double-buffered x + out + pe; fits every generation


def _pick_tile(dim, target, align):
    """Largest tile <= target that is a multiple of `align` and divides `dim`,
    falling back to the full dim (which always satisfies the (8,128) rule)."""
    if dim <= target:
        return dim
    t = (target // align) * align
    while t >= align:
        if dim % t == 0:
            return t
        t -= align
    return dim


def _pick_tiles(L, D, itemsize, align):
    """Prefer td == D (contiguous HBM rows, unmasked full-lane vst); size tl so the
    double-buffered footprint (2*x + 2*out + 2*pe tiles) stays inside the VMEM budget."""
    td = D
    max_rows = max(align, _VMEM_BUDGET // (6 * td * itemsize))
    tl = _pick_tile(L, min(512, max_rows), align)
    if 6 * tl * td * itemsize <= _VMEM_BUDGET:
        return tl, td
    # Very large D: fall back to a lane-dense 128-multiple feature tile.
    tl = _pick_tile(L, 256, align)
    max_lanes = max(128, _VMEM_BUDGET // (6 * tl * itemsize))
    td = _pick_tile(D, (max_lanes // 128) * 128, 128)
    return tl, td


def _pick_batch_block(B, tl, td, itemsize, blocks_ld):
    """Fold batch into the tile when a single (1, tl, td) tile is tiny, amortizing the
    per-grid-step overhead, while (a) staying inside the VMEM budget and (b) keeping
    >= 2 grid steps whenever the problem has them (so both v7x cores get work)."""
    tile_bytes = tl * td * itemsize
    bb = 1
    for cand in range(2, B + 1):
        if B % cand:
            continue
        if cand * tile_bytes > (1 << 20):                    # ~1 MiB/tile is plenty
            break
        if (4 * cand + 2) * tile_bytes > _VMEM_BUDGET:       # 2*x + 2*out + 2*pe buffers
            break
        if blocks_ld * (B // cand) < 2 and blocks_ld * B >= 2:
            break                                            # keep megacore fed
        bb = cand
    return bb


# ----------------------------------------------------------------------------
# Wrapper
# ----------------------------------------------------------------------------
def positional_encoding(x, pe, *, min_pallas_bytes=256 * 1024):
    """x: (B, L, D), pe: (max_len, D) -> x + pe[:L]  (shape (B, L, D))."""
    B, L, D = x.shape
    itemsize = x.dtype.itemsize

    # Small-problem bypass: the fused XLA add beats the pallas_call launch + step overhead.
    if B * L * D * itemsize < min_pallas_bytes:
        return x + pe[:L].astype(x.dtype)

    # dtype-aware sublane alignment (f32 -> 8, bf16 -> 16, int8/fp8 -> 32).
    align = {4: 8, 2: 16, 1: 32}.get(itemsize, 8)

    tl, td = _pick_tiles(L, D, itemsize, align)
    blocks_ld = (L // tl) * (D // td)
    bb = _pick_batch_block(B, tl, td, itemsize, blocks_ld)

    # Pass the FULL pe table (no pe[:L] slice op); the BlockSpec windows rows [0, L).
    # Fallback to a slice only when L is not 8-aligned so the pe block keeps (8,128) legality
    # (then tl == L == the sliced table's full dim).
    pe_arg = pe if tl % 8 == 0 else pe[:L]
    # Dtype-match pe once (no-op if make_pe_table already built it in x.dtype).
    pe_arg = pe_arg.astype(x.dtype)

    # Grid: batch is the FASTEST-varying axis and the pe index_map ignores it, so the pe
    # tile's block index is unchanged across consecutive steps -> not re-DMA'd per batch.
    grid = (L // tl, D // td, B // bb)

    return pl.pallas_call(
        add_pe_kernel,
        out_shape=jax.ShapeDtypeStruct((B, L, D), x.dtype),
        grid=grid,
        in_specs=[
            pl.BlockSpec((bb, tl, td), lambda i, j, b: (b, i, j)),   # x tile
            pl.BlockSpec((tl, td), lambda i, j, b: (i, j)),          # pe tile (batch-invariant)
        ],
        out_specs=pl.BlockSpec((bb, tl, td), lambda i, j, b: (b, i, j)),
        compiler_params=pltpu.CompilerParams(
            dimension_semantics=("parallel", "parallel", "parallel")),
    )(x, pe_arg)


if __name__ == "__main__":
    key = jax.random.PRNGKey(0)
    k_small, k_big = jax.random.split(key)
    MAX_LEN = 4096

    # --- Small shape from the module spec; force the Pallas path to exercise the kernel.
    B, L, D = 2, 8, 32
    x_small = jax.random.normal(k_small, (B, L, D), jnp.float32)
    pe_small = make_pe_table(D, MAX_LEN, dtype=x_small.dtype)
    out_small = positional_encoding(x_small, pe_small, min_pallas_bytes=0)
    jax.block_until_ready(out_small)
    ref_small = x_small + pe_small[:L]
    assert out_small.shape == (B, L, D)
    assert jnp.allclose(out_small, ref_small, atol=1e-6, rtol=1e-6)

    # --- Modest shape that naturally takes the pipelined Pallas path (default bypass logic).
    B2, L2, D2 = 2, 256, 256
    x_big = jax.random.normal(k_big, (B2, L2, D2), jnp.float32)
    pe_big = make_pe_table(D2, MAX_LEN, dtype=x_big.dtype)
    out_big = positional_encoding(x_big, pe_big)
    jax.block_until_ready(out_big)
    ref_big = x_big + pe_big[:L2]
    assert out_big.shape == (B2, L2, D2)
    assert jnp.allclose(out_big, ref_big, atol=1e-6, rtol=1e-6)

    print("KERNEL_OK")
</pallas_src>

<mosaic_0001>
module attributes {stable_mosaic.version = 11 : i64} {
  func.func @add_pe_kernel(%arg0: i32, %arg1: i32, %arg2: i32, %arg3: memref<1x8x32xf32, #tpu.memory_space<vmem>>, %arg4: memref<8x32xf32, #tpu.memory_space<vmem>>, %arg5: memref<1x8x32xf32, #tpu.memory_space<vmem>>) attributes {dimension_semantics = [#tpu.dimension_semantics<parallel>, #tpu.dimension_semantics<parallel>, #tpu.dimension_semantics<parallel>], iteration_bounds = array<i64: 1, 1, 2>, scalar_prefetch = 0 : i64, scratch_operands = 0 : i64, tpu.core_type = #tpu.core_type<tc>, window_params = [{transform_indices = @transform_0, window_bounds = array<i64: 1, 8, 32>}, {transform_indices = @transform_1, window_bounds = array<i64: 8, 32>}, {transform_indices = @transform_2, window_bounds = array<i64: 1, 8, 32>}]} {
    %c0 = arith.constant 0 : index
    %c0_0 = arith.constant 0 : index
    %c0_1 = arith.constant 0 : index
    %0 = vector.load %arg3[%c0, %c0_0, %c0_1] : memref<1x8x32xf32, #tpu.memory_space<vmem>>, vector<1x8x32xf32>
    %c0_2 = arith.constant 0 : index
    %c0_3 = arith.constant 0 : index
    %1 = vector.load %arg4[%c0_2, %c0_3] : memref<8x32xf32, #tpu.memory_space<vmem>>, vector<8x32xf32>
    %2 = vector.shape_cast %1 : vector<8x32xf32> to vector<1x8x32xf32>
    %3 = arith.addf %0, %2 : vector<1x8x32xf32>
    %c0_4 = arith.constant 0 : index
    %c0_5 = arith.constant 0 : index
    %c0_6 = arith.constant 0 : index
    %4 = vector.load %arg5[%c0_4, %c0_5, %c0_6] : memref<1x8x32xf32, #tpu.memory_space<vmem>>, vector<1x8x32xf32>
    tpu.vector_store %arg5[%c0_4, %c0_5, %c0_6], %3 {strides = array<i32>} : memref<1x8x32xf32, #tpu.memory_space<vmem>>, vector<1x8x32xf32>,
    return
  }
  func.func @transform_0(%arg0: i32, %arg1: i32, %arg2: i32) -> (i32, i32, i32) {
    %c0_i32 = arith.constant 0 : i32
    return %arg2, %arg0, %arg1 : i32, i32, i32
  }
  func.func @transform_1(%arg0: i32, %arg1: i32, %arg2: i32) -> (i32, i32) {
    %c0_i32 = arith.constant 0 : i32
    return %arg0, %arg1 : i32, i32
  }
  func.func @transform_2(%arg0: i32, %arg1: i32, %arg2: i32) -> (i32, i32, i32) {
    %c0_i32 = arith.constant 0 : i32
    return %arg2, %arg0, %arg1 : i32, i32, i32
  }
}

</mosaic_0001>

<bundles_post_ra>
// kernel: tpu_custom_call.1
= control target key start
LH: loop header
LB: loop body
LE: loop exit
PB: predicated region body
PF: predicated region fallthrough
CT: control target
= control target key end

     0   :  { %7 = vsyncpa [#allocation3], 0  ;;  %s588_s0 = inlined_call_operand.vmem [shape: f32[2,8,32], index: 0, kind: input, shape index: {}]   ;;  %s589_s1 = inlined_call_operand.vmem [shape: f32[4096,32], index: 1, kind: input, shape index: {}]   ;;  %s590_s2 = inlined_call_operand.hbm [shape: f32[2,8,32], index: 2, kind: output, shape index: {}]  }
   0x1   :  { %9 = vsyncpa [#allocation3 + $0x1], 0  ;;  %s493_s9 = smov 0   ;;  %s495_s10 = smov 0  }
   0x2   :  { %s497_s11 = smov 0   ;;  %s499_s12 = smov 0  }
   0x3   :  { %s501_s13 = smov 0   ;;  %s503_s14 = smov 0  }
   0x4 LB: > { %s331_s15 = sadd.s32 4294967295, %s476_s14   ;;  %s332_s16 = sadd.s32 4294967294, %s476_s14   ;;  %s476_s14 = sphi %s503_s14, %s15_s14   ;;  %s472_s13 = sphi %s501_s13, %s597_s13   ;;  %s468_s12 = sphi %s499_s12, %s596_s12   ;;  %s464_s11 = sphi %s497_s11, %s595_s11   ;;  %s460_s10 = sphi %s495_s10, %s594_s10   ;;  %s456_s9 = sphi %s493_s9, %s593_s9  }
   0x5   : > { %s27_s17 = sadd.s32 1, %s472_s13  ;;  %s103_s18 = sadd.s32 1, %s464_s11 }
   0x6   : > { %p28_p0 = scmp.ge.s32.totalorder %s27_s17, 2  ;;  %p113_p1 = scmp.ne.s32.totalorder %s464_s11, %s460_s10 }
   0x7   : > { %p114_p2 = scmp.eq.s32.totalorder %s331_s15, 1  ;;  %p119_p3 = scmp.ne.s32.totalorder %s460_s10, %s456_s9 }
   0x8   : > { %s599_s17 = smov (%p28_p0, %s27_s17), 0  ;;  %p120_p5 = scmp.eq.s32.totalorder %s332_s16, 1 }
   0x9   : > { %p531_p4 = por %p114_p2, %p113_p1  ;;  %s96_s20 = ssub.s32 %s472_s13, %s599_s17 }
   0xa   : > { %p336_p6 = scmp.ge.s32.totalorder %s476_s14, 1  ;;  %p101_p7 = scmp.eq.s32.totalorder %s96_s20, 0 }
   0xb   : > { %p538_p8 = por %p120_p5, %p119_p3  ;;  %p161_p9 = scmp.lt.s32.totalorder %s476_s14, 3 }
   0xc   : > { %s544_s22 = scalar_select %p101_p7, %s464_s11, %s103_s18  }
   0xd   : > { %p162_p10 = pnand %p336_p6, %p161_p9 }
   0xe   : > { %s192_s23 = sand.u32 (!%p162_p10), 1, %s460_s10   ;;  %p195_p11 = scmp.lt.s32.totalorder (!%p162_p10), %s468_s12, 1 }
   0xf   : > { %165 = sbr.rel (%p162_p10) target bundleno = 33 (0x21), region = 28  ;;  %s337_s24 = sshll.u32 (!%p162_p10), %s192_s23, 3 }
  0x10   : > { %s340_s25 = sshll.u32 (!%p162_p10), %s468_s12, 3  ;;  %s194_s4 = scalar_lea.vmem (!%p162_p10), [#allocation2], %s337_s24 }
  0x11   : > { %s230_s28 = scalar_lea.hbm (!%p162_p10), %s590_s2, %s340_s25  ;;  %s232_s5 = sshll.u32 (!%p162_p10), %s194_s4, 4  ;;  %s233_s5 = int_to_ptr.vmem [resolvable:$true] %s232_s5 }
  0x12   : > { %s234_s15 = sshll.u32 (!%p162_p10), %s230_s28, 4  ;;  %s218_s16 = scalar_lea.sflag (!%p162_p10), [#allocation3], %s192_s23  ;;  %s235_s15 = int_to_ptr.hbm [resolvable:$true] %s234_s15 }
  0x13   : > { %s418_s25 = scalar_lea.hbm (!%p162_p10), %s590_s2, 16 }
  0x14   : > { %s601_s12 = smov (!%p195_p11, %s468_s12), 1  ;;  %v213_v0 = vld [vmem:[%s589_s1] sm:$0xff]  ;;  %vm215_vm0 = vcmask 261120  }
  0x15   : > { %s338_s29 = sshll.u32 %s601_s12, 3  ;;  %s412_s12 = sshra.s32 %s235_s15, 4  ;;  %s413_s12 = int_to_ptr.hbm [resolvable:$true] %s412_s12 }
  0x16   : > { %s204_s8 = scalar_lea.vmem %s588_s0, %s338_s29  ;;  %s414_s18 = scalar_lea.hbm %s413_s12, 8 }
  0x17   : > { %v212_v1 = vld [vmem:[%s204_s8] sm:$0xff]  ;;  %p415_p12 = scmp.ne.s32.totalorder %s413_s12, %s414_s18  ;;  %p419_p1 = scmp.lt.s32.totalorder %s413_s12, %s590_s2 }
  0x18   : > { %v214_v2 = vadd.f32 %v213_v0, %v212_v1  ;;  %p420_p2 = scmp.lt.s32.totalorder %s418_s25, %s414_s18 }
  0x19   : > { %p416_p13 = pnand %p415_p12, %p531_p4 }
  0x1a   : > { %216 = vst.msk [vmem:[%s194_s4] sm:$0xff] %vm215_vm0, %v214_v2  ;;  %p421_p3 = por %p420_p2, %p419_p1 }
  0x1b   : > { %p417_p0 = pneg %p416_p13 }
  0x1d   : > { %p422_p5 = pnand %p421_p3, %p417_p0 }
  0x1f   : > { %425 = shalt.err (!%p422_p5)
}
  0x20   : > { %343 = dma.vmem_to_hbm [thread:$0]  (%p531_p4), %s233_s5, 128, %s235_s15, %s218_s16  }
  0x21 PF: > { %p349_p6 = scmp.ge.s32.totalorder %s476_s14, 2  ;;  %s246_s23 = sand.u32 1, %s456_s9  }
  0x22   : > { %s247_s28 = scalar_lea.sflag [#allocation3], %s246_s23 }
  0x23   : > { %p346_p7 = pnand %p349_p6, %p538_p8 }
  0x25   : > { %p347_p9 = pneg %p346_p7 }
  0x27   : > { %451 = dma.done.wait (%p347_p9), %s247_s28, 128  }
  0x28   : > { %453 = vsyncadd (%p347_p9), %s247_s28, 4294967168  ;;  %s15_s14 = sadd.s32 1, %s476_s14   ;;  %s593_s9 = smov %s460_s10 }
  0x29   : > { %p12_p10 = scmp.ge.s32.totalorder %s15_s14, 4   ;;  %s594_s10 = smov %s464_s11 }
  0x2a   : > { %s595_s11 = smov %s544_s22  ;;  %s596_s12 = smov %s472_s13 }
  0x2b   : > { %s597_s13 = smov %s599_s17  ;;  %14 = sbr.rel (!%p12_p10) target bundleno = 4 (0x4), region = 66 }
  0x30   :  { %253 = vsyncpa [#allocation3], 1 }
  0x31   :  { %255 = vsyncpa [#allocation3 + $0x1], 1 }

</bundles_post_ra>
